<compile_context>
chip_gen: v5e
topology: v5e:2x2
jax: 0.10.0
libtpu: 0.0.40
codegen_flags: <defaults>
</compile_context>

<pallas_src>
import functools

import jax
import jax.numpy as jnp
from jax import lax
from jax.experimental import pallas as pl
from jax.experimental.pallas import tpu as pltpu


def _round_up(x, m):
    return ((x + m - 1) // m) * m


def residual_block_kernel(xs_ref, w1_ref, b1_ref, w2_ref, b2_ref, wr_ref,
                          o_ref, *, K, pad, dilation, L):
    # xs_ref : (2K-1, C_in, bc) pre-shifted x; plane m holds x[:, t + m*dil - 2*pad]
    #          (zero outside its own batch element).
    # w1_ref : (K, C_out, C_in)   conv1 taps.
    # w2_ref : (K, C_out, C_out)  conv2 taps.
    # b1/b2  : (C_out, 1)         f32 biases.
    # wr_ref : (C_out, C_in)      1x1 residual conv (no bias).
    # o_ref  : (C_out, bc)        f32 output block.
    bc = o_ref.shape[-1]
    c_out = o_ref.shape[0]

    # Position of each column inside its batch element (columns are n*L + t).
    gcol = pl.program_id(0) * bc + lax.broadcasted_iota(jnp.int32, (1, bc), 1)
    pos = gcol % L

    b1 = b1_ref[...]
    b2 = b2_ref[...]

    # Residual path: 1x1 conv on the unshifted copy (plane K-1 <=> shift 0,
    # because 2*pad == dilation*(K-1) for same-length convs).
    x0 = xs_ref[K - 1]
    out = jnp.dot(wr_ref[...], x0, preferred_element_type=jnp.float32) + b2

    # conv2 tap k needs h shifted by off2 = k*dil - pad.  Recompute it from the
    # pre-shifted x planes (combined offset index = j + k) — no lane movement.
    for k in range(K):
        off2 = k * dilation - pad
        acc = jnp.zeros((c_out, bc), jnp.float32)
        for j in range(K):
            acc = acc + jnp.dot(w1_ref[j], xs_ref[j + k],
                                preferred_element_type=jnp.float32)
        h = jnp.maximum(acc + b1, 0.0)
        # TODO(synk): dropout between relu and conv2 is identity in eval mode;
        # training-mode RNG dropout not implemented.
        src = pos + off2
        valid = jnp.logical_and(src >= 0, src < L)
        h = jnp.where(valid, h, 0.0)
        out = out + jnp.dot(w2_ref[k], h.astype(w2_ref.dtype),
                            preferred_element_type=jnp.float32)

    o_ref[...] = out


def _shifted_copies(x, K, pad, dilation):
    """(N, C, L) -> (2K-1, N, C, L); plane m is x shifted by m*dil - 2*pad along
    time, zero filled per batch element."""
    halo = 2 * pad
    N, C, L = x.shape
    xp = jnp.pad(x, ((0, 0), (0, 0), (halo, halo)))
    planes = []
    for m in range(2 * K - 1):
        start = m * dilation          # == (m*dilation - halo) + halo, in [0, 2*halo]
        planes.append(lax.slice_in_dim(xp, start, start + L, axis=2))
    return jnp.stack(planes, axis=0)


def _pick_block_cols(padded_cols, target=2048):
    """Largest multiple of 128 dividing padded_cols and <= target."""
    if padded_cols <= target:
        return padded_cols
    units = padded_cols // 128
    best = 1
    for d in range(1, units + 1):
        if units % d == 0 and d * 128 <= target:
            best = d
    return best * 128


def residual_block(x, w1, b1, w2, b2, wr, *, kernel_size=3, stride=1,
                   dilation=1, padding=None, compute_dtype=jnp.float32):
    """Eval-mode ResidualBlock forward.  x: (N, C_in, L) -> (N, C_out, L)."""
    if stride != 1:
        raise NotImplementedError("stride != 1 not supported")  # TODO(synk): strided conv not implemented.
    N, C_in, L = x.shape
    C_out = w1.shape[0]
    K = kernel_size
    if padding is None:
        padding = (K - 1) * dilation // 2
    pad = padding
    if 2 * pad != dilation * (K - 1):
        raise NotImplementedError("only same-length convolutions are supported")

    total = N * L
    padded_total = _round_up(total, 128)
    block_cols = _pick_block_cols(padded_total)
    num_blocks = padded_total // block_cols

    # Pre-shifted, batch-flattened, lane-padded input planes: (2K-1, C_in, cols).
    xs = _shifted_copies(x, K, pad, dilation)                  # (2K-1, N, C_in, L)
    xs = xs.transpose(0, 2, 1, 3).reshape(2 * K - 1, C_in, total)
    xs = jnp.pad(xs, ((0, 0), (0, 0), (0, padded_total - total)))
    xs = xs.astype(compute_dtype)

    w1_t = jnp.transpose(w1, (2, 0, 1)).astype(compute_dtype)  # (K, C_out, C_in)
    w2_t = jnp.transpose(w2, (2, 0, 1)).astype(compute_dtype)  # (K, C_out, C_out)
    wr_c = wr.reshape(C_out, C_in).astype(compute_dtype)
    b1_c = b1.reshape(C_out, 1).astype(jnp.float32)
    b2_c = b2.reshape(C_out, 1).astype(jnp.float32)

    kernel = functools.partial(residual_block_kernel, K=K, pad=pad,
                               dilation=dilation, L=L)

    out_flat = pl.pallas_call(
        kernel,
        out_shape=jax.ShapeDtypeStruct((C_out, padded_total), jnp.float32),
        grid_spec=pltpu.PrefetchScalarGridSpec(
            num_scalar_prefetch=0,
            grid=(num_blocks,),
            in_specs=[
                pl.BlockSpec((2 * K - 1, C_in, block_cols), lambda i: (0, 0, i)),
                pl.BlockSpec((K, C_out, C_in), lambda i: (0, 0, 0)),
                pl.BlockSpec((C_out, 1), lambda i: (0, 0)),
                pl.BlockSpec((K, C_out, C_out), lambda i: (0, 0, 0)),
                pl.BlockSpec((C_out, 1), lambda i: (0, 0)),
                pl.BlockSpec((C_out, C_in), lambda i: (0, 0)),
            ],
            out_specs=pl.BlockSpec((C_out, block_cols), lambda i: (0, i)),
        ),
        compiler_params=pltpu.CompilerParams(
            dimension_semantics=("parallel",),
            vmem_limit_bytes=48 * 1024 * 1024,   # headroom under v7x's 64 MiB VMEM
        ),
    )(xs, w1_t, b1_c, w2_t, b2_c, wr_c)

    out = out_flat[:, :total].reshape(C_out, N, L)
    return out.transpose(1, 0, 2)


def reference_forward(x, w1, b1, w2, b2, wr, *, pad, dilation=1,
                      compute_dtype=jnp.float32):
    """Pure-JAX reference matching PyTorch Conv1d semantics (eval mode)."""
    dn = ("NCH", "OIH", "NCH")
    xc = x.astype(compute_dtype)
    wr3 = wr.reshape(wr.shape[0], -1)[:, :, None].astype(compute_dtype)
    res = lax.conv_general_dilated(
        xc, wr3, (1,), [(0, 0)], dimension_numbers=dn,
        preferred_element_type=jnp.float32)
    h = lax.conv_general_dilated(
        xc, w1.astype(compute_dtype), (1,), [(pad, pad)],
        rhs_dilation=(dilation,), dimension_numbers=dn,
        preferred_element_type=jnp.float32)
    h = jnp.maximum(h + b1[None, :, None], 0.0)
    out = lax.conv_general_dilated(
        h.astype(compute_dtype), w2.astype(compute_dtype), (1,), [(pad, pad)],
        rhs_dilation=(dilation,), dimension_numbers=dn,
        preferred_element_type=jnp.float32)
    return out + b2[None, :, None] + res


if __name__ == "__main__":
    # Small shapes consistent with the module: batch=2, in_ch=4, out_ch=8, L=16.
    N, C_IN, C_OUT, L, K = 2, 4, 8, 16, 3

    key = jax.random.PRNGKey(0)
    kx, k1, kb1, k2, kb2, kr = jax.random.split(key, 6)

    x = jax.random.normal(kx, (N, C_IN, L), dtype=jnp.float32)
    w1 = jax.random.normal(k1, (C_OUT, C_IN, K), dtype=jnp.float32) * 0.1
    b1 = jax.random.normal(kb1, (C_OUT,), dtype=jnp.float32) * 0.1
    w2 = jax.random.normal(k2, (C_OUT, C_OUT, K), dtype=jnp.float32) * 0.1
    b2 = jax.random.normal(kb2, (C_OUT,), dtype=jnp.float32) * 0.1
    wr = jax.random.normal(kr, (C_OUT, C_IN), dtype=jnp.float32) * 0.1

    # Check the undilated and a dilated configuration (TCN blocks use dilation>1).
    for dil in (1, 2):
        pad = (K - 1) * dil // 2
        out = residual_block(x, w1, b1, w2, b2, wr, kernel_size=K, dilation=dil)
        out = jax.block_until_ready(out)
        ref = reference_forward(x, w1, b1, w2, b2, wr, pad=pad, dilation=dil)
        assert out.shape == (N, C_OUT, L)
        # Tolerance covers default-precision MXU passes on real hardware.
        assert jnp.allclose(out, ref, atol=1e-2, rtol=1e-2), \
            f"mismatch vs reference (dilation={dil})"

    print("KERNEL_OK")
</pallas_src>

<mosaic_0001>
module attributes {stable_mosaic.version = 11 : i64} {
  func.func @residual_block_kernel(%arg0: i32, %arg1: memref<5x4x128xf32, #tpu.memory_space<vmem>>, %arg2: memref<3x8x4xf32, #tpu.memory_space<vmem>>, %arg3: memref<8x1xf32, #tpu.memory_space<vmem>>, %arg4: memref<3x8x8xf32, #tpu.memory_space<vmem>>, %arg5: memref<8x1xf32, #tpu.memory_space<vmem>>, %arg6: memref<8x4xf32, #tpu.memory_space<vmem>>, %arg7: memref<8x128xf32, #tpu.memory_space<vmem>>) attributes {dimension_semantics = [#tpu.dimension_semantics<parallel>], iteration_bounds = array<i64: 1>, scalar_prefetch = 0 : i64, scratch_operands = 0 : i64, tpu.core_type = #tpu.core_type<tc>, window_params = [{transform_indices = @transform_0, window_bounds = array<i64: 5, 4, 128>}, {pipeline_mode = #tpu.pipeline_mode<synchronous>, transform_indices = @transform_1, window_bounds = array<i64: 3, 8, 4>}, {pipeline_mode = #tpu.pipeline_mode<synchronous>, transform_indices = @transform_2, window_bounds = array<i64: 8, 1>}, {pipeline_mode = #tpu.pipeline_mode<synchronous>, transform_indices = @transform_3, window_bounds = array<i64: 3, 8, 8>}, {pipeline_mode = #tpu.pipeline_mode<synchronous>, transform_indices = @transform_4, window_bounds = array<i64: 8, 1>}, {pipeline_mode = #tpu.pipeline_mode<synchronous>, transform_indices = @transform_5, window_bounds = array<i64: 8, 4>}, {transform_indices = @transform_6, window_bounds = array<i64: 8, 128>}]} {
    %c128_i32 = arith.constant 128 : i32
    %0 = arith.muli %arg0, %c128_i32 : i32
    %1 = tpu.iota {dimensions = array<i32: 1>} : vector<1x128xi32>
    %2 = vector.broadcast %0 : i32 to vector<1x128xi32>
    %3 = arith.addi %2, %1 : vector<1x128xi32>
    %c16_i32 = arith.constant 16 : i32
    %c0_i32 = arith.constant 0 : i32
    %4 = arith.cmpi eq, %c16_i32, %c0_i32 : i32
    %c1_i32 = arith.constant 1 : i32
    %5 = arith.select %4, %c1_i32, %c16_i32 : i32
    %6 = vector.broadcast %5 : i32 to vector<1x128xi32>
    %7 = arith.remsi %3, %6 : vector<1x128xi32>
    %c0_i32_0 = arith.constant 0 : i32
    %8 = vector.broadcast %c0_i32_0 : i32 to vector<1x128xi32>
    %9 = arith.cmpi ne, %7, %8 : vector<1x128xi32>
    %c0_i32_1 = arith.constant 0 : i32
    %10 = vector.broadcast %c0_i32_1 : i32 to vector<1x128xi32>
    %11 = arith.cmpi slt, %7, %10 : vector<1x128xi32>
    %c0_i32_2 = arith.constant 0 : i32
    %12 = arith.cmpi slt, %5, %c0_i32_2 : i32
    %13 = vector.broadcast %12 : i1 to vector<1x128xi1>
    %14 = vector.broadcast %13 : vector<1x128xi1> to vector<1x128xi1>
    %15 = arith.xori %11, %14 : vector<1x128xi1>
    %16 = arith.andi %15, %9 : vector<1x128xi1>
    %17 = vector.broadcast %5 : i32 to vector<1x128xi32>
    %18 = arith.addi %7, %17 : vector<1x128xi32>
    %19 = arith.select %16, %18, %7 : vector<1x128xi1>, vector<1x128xi32>
    %c0 = arith.constant 0 : index
    %c0_3 = arith.constant 0 : index
    %20 = vector.load %arg3[%c0, %c0_3] : memref<8x1xf32, #tpu.memory_space<vmem>>, vector<8x1xf32>
    %c0_4 = arith.constant 0 : index
    %c0_5 = arith.constant 0 : index
    %21 = vector.load %arg5[%c0_4, %c0_5] : memref<8x1xf32, #tpu.memory_space<vmem>>, vector<8x1xf32>
    %c2 = arith.constant 2 : index
    %c0_6 = arith.constant 0 : index
    %c0_7 = arith.constant 0 : index
    %22 = vector.load %arg1[%c2, %c0_6, %c0_7] : memref<5x4x128xf32, #tpu.memory_space<vmem>>, vector<1x4x128xf32>
    %23 = vector.shape_cast %22 : vector<1x4x128xf32> to vector<4x128xf32>
    %c0_8 = arith.constant 0 : index
    %c0_9 = arith.constant 0 : index
    %24 = vector.load %arg6[%c0_8, %c0_9] : memref<8x4xf32, #tpu.memory_space<vmem>>, vector<8x4xf32>
    %cst = arith.constant dense<0.000000e+00> : vector<8x128xf32>
    %25 = tpu.matmul %24, %23, %cst {dimension_numbers = #tpu.dot_dimension_numbers<[1], [0], [0], [1], [0, 0, 1, 1], [], []>} : vector<8x4xf32>, vector<4x128xf32>, vector<8x128xf32> -> vector<8x128xf32>
    %26 = vector.broadcast %21 : vector<8x1xf32> to vector<8x128xf32>
    %27 = arith.addf %25, %26 : vector<8x128xf32>
    %cst_10 = arith.constant 0.000000e+00 : f32
    %28 = vector.broadcast %cst_10 : f32 to vector<8x128xf32>
    %c0_11 = arith.constant 0 : index
    %c0_12 = arith.constant 0 : index
    %c0_13 = arith.constant 0 : index
    %29 = vector.load %arg2[%c0_11, %c0_12, %c0_13] : memref<3x8x4xf32, #tpu.memory_space<vmem>>, vector<1x8x4xf32>
    %30 = vector.shape_cast %29 : vector<1x8x4xf32> to vector<8x4xf32>
    %c0_14 = arith.constant 0 : index
    %c0_15 = arith.constant 0 : index
    %c0_16 = arith.constant 0 : index
    %31 = vector.load %arg1[%c0_14, %c0_15, %c0_16] : memref<5x4x128xf32, #tpu.memory_space<vmem>>, vector<1x4x128xf32>
    %32 = vector.shape_cast %31 : vector<1x4x128xf32> to vector<4x128xf32>
    %cst_17 = arith.constant dense<0.000000e+00> : vector<8x128xf32>
    %33 = tpu.matmul %30, %32, %cst_17 {dimension_numbers = #tpu.dot_dimension_numbers<[1], [0], [0], [1], [0, 0, 1, 1], [], []>} : vector<8x4xf32>, vector<4x128xf32>, vector<8x128xf32> -> vector<8x128xf32>
    %34 = arith.addf %28, %33 : vector<8x128xf32>
    %c1 = arith.constant 1 : index
    %c0_18 = arith.constant 0 : index
    %c0_19 = arith.constant 0 : index
    %35 = vector.load %arg2[%c1, %c0_18, %c0_19] : memref<3x8x4xf32, #tpu.memory_space<vmem>>, vector<1x8x4xf32>
    %36 = vector.shape_cast %35 : vector<1x8x4xf32> to vector<8x4xf32>
    %c1_20 = arith.constant 1 : index
    %c0_21 = arith.constant 0 : index
    %c0_22 = arith.constant 0 : index
    %37 = vector.load %arg1[%c1_20, %c0_21, %c0_22] : memref<5x4x128xf32, #tpu.memory_space<vmem>>, vector<1x4x128xf32>
    %38 = vector.shape_cast %37 : vector<1x4x128xf32> to vector<4x128xf32>
    %cst_23 = arith.constant dense<0.000000e+00> : vector<8x128xf32>
    %39 = tpu.matmul %36, %38, %cst_23 {dimension_numbers = #tpu.dot_dimension_numbers<[1], [0], [0], [1], [0, 0, 1, 1], [], []>} : vector<8x4xf32>, vector<4x128xf32>, vector<8x128xf32> -> vector<8x128xf32>
    %40 = arith.addf %34, %39 : vector<8x128xf32>
    %c2_24 = arith.constant 2 : index
    %c0_25 = arith.constant 0 : index
    %c0_26 = arith.constant 0 : index
    %41 = vector.load %arg2[%c2_24, %c0_25, %c0_26] : memref<3x8x4xf32, #tpu.memory_space<vmem>>, vector<1x8x4xf32>
    %42 = vector.shape_cast %41 : vector<1x8x4xf32> to vector<8x4xf32>
    %c2_27 = arith.constant 2 : index
    %c0_28 = arith.constant 0 : index
    %c0_29 = arith.constant 0 : index
    %43 = vector.load %arg1[%c2_27, %c0_28, %c0_29] : memref<5x4x128xf32, #tpu.memory_space<vmem>>, vector<1x4x128xf32>
    %44 = vector.shape_cast %43 : vector<1x4x128xf32> to vector<4x128xf32>
    %cst_30 = arith.constant dense<0.000000e+00> : vector<8x128xf32>
    %45 = tpu.matmul %42, %44, %cst_30 {dimension_numbers = #tpu.dot_dimension_numbers<[1], [0], [0], [1], [0, 0, 1, 1], [], []>} : vector<8x4xf32>, vector<4x128xf32>, vector<8x128xf32> -> vector<8x128xf32>
    %46 = arith.addf %40, %45 : vector<8x128xf32>
    %47 = vector.broadcast %20 : vector<8x1xf32> to vector<8x128xf32>
    %48 = arith.addf %46, %47 : vector<8x128xf32>
    %cst_31 = arith.constant 0.000000e+00 : f32
    %49 = vector.broadcast %cst_31 : f32 to vector<8x128xf32>
    %50 = arith.maximumf %48, %49 : vector<8x128xf32>
    %c-1_i32 = arith.constant -1 : i32
    %51 = vector.broadcast %c-1_i32 : i32 to vector<1x128xi32>
    %52 = arith.addi %19, %51 : vector<1x128xi32>
    %c0_i32_32 = arith.constant 0 : i32
    %53 = vector.broadcast %c0_i32_32 : i32 to vector<1x128xi32>
    %54 = arith.cmpi sge, %52, %53 : vector<1x128xi32>
    %c16_i32_33 = arith.constant 16 : i32
    %55 = vector.broadcast %c16_i32_33 : i32 to vector<1x128xi32>
    %56 = arith.cmpi slt, %52, %55 : vector<1x128xi32>
    %57 = arith.andi %54, %56 : vector<1x128xi1>
    %cst_34 = arith.constant 0.000000e+00 : f32
    %58 = vector.shape_cast %57 : vector<1x128xi1> to vector<1x128xi1>
    %59 = vector.broadcast %58 : vector<1x128xi1> to vector<8x128xi1>
    %60 = vector.broadcast %cst_34 : f32 to vector<8x128xf32>
    %61 = arith.select %59, %50, %60 : vector<8x128xi1>, vector<8x128xf32>
    %c0_35 = arith.constant 0 : index
    %c0_36 = arith.constant 0 : index
    %c0_37 = arith.constant 0 : index
    %62 = vector.load %arg4[%c0_35, %c0_36, %c0_37] : memref<3x8x8xf32, #tpu.memory_space<vmem>>, vector<1x8x8xf32>
    %63 = vector.shape_cast %62 : vector<1x8x8xf32> to vector<8x8xf32>
    %cst_38 = arith.constant dense<0.000000e+00> : vector<8x128xf32>
    %64 = tpu.matmul %63, %61, %cst_38 {dimension_numbers = #tpu.dot_dimension_numbers<[1], [0], [0], [1], [0, 0, 1, 1], [], []>} : vector<8x8xf32>, vector<8x128xf32>, vector<8x128xf32> -> vector<8x128xf32>
    %65 = arith.addf %27, %64 : vector<8x128xf32>
    %cst_39 = arith.constant 0.000000e+00 : f32
    %66 = vector.broadcast %cst_39 : f32 to vector<8x128xf32>
    %c0_40 = arith.constant 0 : index
    %c0_41 = arith.constant 0 : index
    %c0_42 = arith.constant 0 : index
    %67 = vector.load %arg2[%c0_40, %c0_41, %c0_42] : memref<3x8x4xf32, #tpu.memory_space<vmem>>, vector<1x8x4xf32>
    %68 = vector.shape_cast %67 : vector<1x8x4xf32> to vector<8x4xf32>
    %c1_43 = arith.constant 1 : index
    %c0_44 = arith.constant 0 : index
    %c0_45 = arith.constant 0 : index
    %69 = vector.load %arg1[%c1_43, %c0_44, %c0_45] : memref<5x4x128xf32, #tpu.memory_space<vmem>>, vector<1x4x128xf32>
    %70 = vector.shape_cast %69 : vector<1x4x128xf32> to vector<4x128xf32>
    %cst_46 = arith.constant dense<0.000000e+00> : vector<8x128xf32>
    %71 = tpu.matmul %68, %70, %cst_46 {dimension_numbers = #tpu.dot_dimension_numbers<[1], [0], [0], [1], [0, 0, 1, 1], [], []>} : vector<8x4xf32>, vector<4x128xf32>, vector<8x128xf32> -> vector<8x128xf32>
    %72 = arith.addf %66, %71 : vector<8x128xf32>
    %c1_47 = arith.constant 1 : index
    %c0_48 = arith.constant 0 : index
    %c0_49 = arith.constant 0 : index
    %73 = vector.load %arg2[%c1_47, %c0_48, %c0_49] : memref<3x8x4xf32, #tpu.memory_space<vmem>>, vector<1x8x4xf32>
    %74 = vector.shape_cast %73 : vector<1x8x4xf32> to vector<8x4xf32>
    %c2_50 = arith.constant 2 : index
    %c0_51 = arith.constant 0 : index
    %c0_52 = arith.constant 0 : index
    %75 = vector.load %arg1[%c2_50, %c0_51, %c0_52] : memref<5x4x128xf32, #tpu.memory_space<vmem>>, vector<1x4x128xf32>
    %76 = vector.shape_cast %75 : vector<1x4x128xf32> to vector<4x128xf32>
    %cst_53 = arith.constant dense<0.000000e+00> : vector<8x128xf32>
    %77 = tpu.matmul %74, %76, %cst_53 {dimension_numbers = #tpu.dot_dimension_numbers<[1], [0], [0], [1], [0, 0, 1, 1], [], []>} : vector<8x4xf32>, vector<4x128xf32>, vector<8x128xf32> -> vector<8x128xf32>
    %78 = arith.addf %72, %77 : vector<8x128xf32>
    %c2_54 = arith.constant 2 : index
    %c0_55 = arith.constant 0 : index
    %c0_56 = arith.constant 0 : index
    %79 = vector.load %arg2[%c2_54, %c0_55, %c0_56] : memref<3x8x4xf32, #tpu.memory_space<vmem>>, vector<1x8x4xf32>
    %80 = vector.shape_cast %79 : vector<1x8x4xf32> to vector<8x4xf32>
    %c3 = arith.constant 3 : index
    %c0_57 = arith.constant 0 : index
    %c0_58 = arith.constant 0 : index
    %81 = vector.load %arg1[%c3, %c0_57, %c0_58] : memref<5x4x128xf32, #tpu.memory_space<vmem>>, vector<1x4x128xf32>
    %82 = vector.shape_cast %81 : vector<1x4x128xf32> to vector<4x128xf32>
    %cst_59 = arith.constant dense<0.000000e+00> : vector<8x128xf32>
    %83 = tpu.matmul %80, %82, %cst_59 {dimension_numbers = #tpu.dot_dimension_numbers<[1], [0], [0], [1], [0, 0, 1, 1], [], []>} : vector<8x4xf32>, vector<4x128xf32>, vector<8x128xf32> -> vector<8x128xf32>
    %84 = arith.addf %78, %83 : vector<8x128xf32>
    %85 = vector.broadcast %20 : vector<8x1xf32> to vector<8x128xf32>
    %86 = arith.addf %84, %85 : vector<8x128xf32>
    %cst_60 = arith.constant 0.000000e+00 : f32
    %87 = vector.broadcast %cst_60 : f32 to vector<8x128xf32>
    %88 = arith.maximumf %86, %87 : vector<8x128xf32>
    %c0_i32_61 = arith.constant 0 : i32
    %89 = vector.broadcast %c0_i32_61 : i32 to vector<1x128xi32>
    %90 = arith.addi %19, %89 : vector<1x128xi32>
    %c0_i32_62 = arith.constant 0 : i32
    %91 = vector.broadcast %c0_i32_62 : i32 to vector<1x128xi32>
    %92 = arith.cmpi sge, %90, %91 : vector<1x128xi32>
    %c16_i32_63 = arith.constant 16 : i32
    %93 = vector.broadcast %c16_i32_63 : i32 to vector<1x128xi32>
    %94 = arith.cmpi slt, %90, %93 : vector<1x128xi32>
    %95 = arith.andi %92, %94 : vector<1x128xi1>
    %cst_64 = arith.constant 0.000000e+00 : f32
    %96 = vector.shape_cast %95 : vector<1x128xi1> to vector<1x128xi1>
    %97 = vector.broadcast %96 : vector<1x128xi1> to vector<8x128xi1>
    %98 = vector.broadcast %cst_64 : f32 to vector<8x128xf32>
    %99 = arith.select %97, %88, %98 : vector<8x128xi1>, vector<8x128xf32>
    %c1_65 = arith.constant 1 : index
    %c0_66 = arith.constant 0 : index
    %c0_67 = arith.constant 0 : index
    %100 = vector.load %arg4[%c1_65, %c0_66, %c0_67] : memref<3x8x8xf32, #tpu.memory_space<vmem>>, vector<1x8x8xf32>
    %101 = vector.shape_cast %100 : vector<1x8x8xf32> to vector<8x8xf32>
    %cst_68 = arith.constant dense<0.000000e+00> : vector<8x128xf32>
    %102 = tpu.matmul %101, %99, %cst_68 {dimension_numbers = #tpu.dot_dimension_numbers<[1], [0], [0], [1], [0, 0, 1, 1], [], []>} : vector<8x8xf32>, vector<8x128xf32>, vector<8x128xf32> -> vector<8x128xf32>
    %103 = arith.addf %65, %102 : vector<8x128xf32>
    %cst_69 = arith.constant 0.000000e+00 : f32
    %104 = vector.broadcast %cst_69 : f32 to vector<8x128xf32>
    %c0_70 = arith.constant 0 : index
    %c0_71 = arith.constant 0 : index
    %c0_72 = arith.constant 0 : index
    %105 = vector.load %arg2[%c0_70, %c0_71, %c0_72] : memref<3x8x4xf32, #tpu.memory_space<vmem>>, vector<1x8x4xf32>
    %106 = vector.shape_cast %105 : vector<1x8x4xf32> to vector<8x4xf32>
    %c2_73 = arith.constant 2 : index
    %c0_74 = arith.constant 0 : index
    %c0_75 = arith.constant 0 : index
    %107 = vector.load %arg1[%c2_73, %c0_74, %c0_75] : memref<5x4x128xf32, #tpu.memory_space<vmem>>, vector<1x4x128xf32>
    %108 = vector.shape_cast %107 : vector<1x4x128xf32> to vector<4x128xf32>
    %cst_76 = arith.constant dense<0.000000e+00> : vector<8x128xf32>
    %109 = tpu.matmul %106, %108, %cst_76 {dimension_numbers = #tpu.dot_dimension_numbers<[1], [0], [0], [1], [0, 0, 1, 1], [], []>} : vector<8x4xf32>, vector<4x128xf32>, vector<8x128xf32> -> vector<8x128xf32>
    %110 = arith.addf %104, %109 : vector<8x128xf32>
    %c1_77 = arith.constant 1 : index
    %c0_78 = arith.constant 0 : index
    %c0_79 = arith.constant 0 : index
    %111 = vector.load %arg2[%c1_77, %c0_78, %c0_79] : memref<3x8x4xf32, #tpu.memory_space<vmem>>, vector<1x8x4xf32>
    %112 = vector.shape_cast %111 : vector<1x8x4xf32> to vector<8x4xf32>
    %c3_80 = arith.constant 3 : index
    %c0_81 = arith.constant 0 : index
    %c0_82 = arith.constant 0 : index
    %113 = vector.load %arg1[%c3_80, %c0_81, %c0_82] : memref<5x4x128xf32, #tpu.memory_space<vmem>>, vector<1x4x128xf32>
    %114 = vector.shape_cast %113 : vector<1x4x128xf32> to vector<4x128xf32>
    %cst_83 = arith.constant dense<0.000000e+00> : vector<8x128xf32>
    %115 = tpu.matmul %112, %114, %cst_83 {dimension_numbers = #tpu.dot_dimension_numbers<[1], [0], [0], [1], [0, 0, 1, 1], [], []>} : vector<8x4xf32>, vector<4x128xf32>, vector<8x128xf32> -> vector<8x128xf32>
    %116 = arith.addf %110, %115 : vector<8x128xf32>
    %c2_84 = arith.constant 2 : index
    %c0_85 = arith.constant 0 : index
    %c0_86 = arith.constant 0 : index
    %117 = vector.load %arg2[%c2_84, %c0_85, %c0_86] : memref<3x8x4xf32, #tpu.memory_space<vmem>>, vector<1x8x4xf32>
    %118 = vector.shape_cast %117 : vector<1x8x4xf32> to vector<8x4xf32>
    %c4 = arith.constant 4 : index
    %c0_87 = arith.constant 0 : index
    %c0_88 = arith.constant 0 : index
    %119 = vector.load %arg1[%c4, %c0_87, %c0_88] : memref<5x4x128xf32, #tpu.memory_space<vmem>>, vector<1x4x128xf32>
    %120 = vector.shape_cast %119 : vector<1x4x128xf32> to vector<4x128xf32>
    %cst_89 = arith.constant dense<0.000000e+00> : vector<8x128xf32>
    %121 = tpu.matmul %118, %120, %cst_89 {dimension_numbers = #tpu.dot_dimension_numbers<[1], [0], [0], [1], [0, 0, 1, 1], [], []>} : vector<8x4xf32>, vector<4x128xf32>, vector<8x128xf32> -> vector<8x128xf32>
    %122 = arith.addf %116, %121 : vector<8x128xf32>
    %123 = vector.broadcast %20 : vector<8x1xf32> to vector<8x128xf32>
    %124 = arith.addf %122, %123 : vector<8x128xf32>
    %cst_90 = arith.constant 0.000000e+00 : f32
    %125 = vector.broadcast %cst_90 : f32 to vector<8x128xf32>
    %126 = arith.maximumf %124, %125 : vector<8x128xf32>
    %c1_i32_91 = arith.constant 1 : i32
    %127 = vector.broadcast %c1_i32_91 : i32 to vector<1x128xi32>
    %128 = arith.addi %19, %127 : vector<1x128xi32>
    %c0_i32_92 = arith.constant 0 : i32
    %129 = vector.broadcast %c0_i32_92 : i32 to vector<1x128xi32>
    %130 = arith.cmpi sge, %128, %129 : vector<1x128xi32>
    %c16_i32_93 = arith.constant 16 : i32
    %131 = vector.broadcast %c16_i32_93 : i32 to vector<1x128xi32>
    %132 = arith.cmpi slt, %128, %131 : vector<1x128xi32>
    %133 = arith.andi %130, %132 : vector<1x128xi1>
    %cst_94 = arith.constant 0.000000e+00 : f32
    %134 = vector.shape_cast %133 : vector<1x128xi1> to vector<1x128xi1>
    %135 = vector.broadcast %134 : vector<1x128xi1> to vector<8x128xi1>
    %136 = vector.broadcast %cst_94 : f32 to vector<8x128xf32>
    %137 = arith.select %135, %126, %136 : vector<8x128xi1>, vector<8x128xf32>
    %c2_95 = arith.constant 2 : index
    %c0_96 = arith.constant 0 : index
    %c0_97 = arith.constant 0 : index
    %138 = vector.load %arg4[%c2_95, %c0_96, %c0_97] : memref<3x8x8xf32, #tpu.memory_space<vmem>>, vector<1x8x8xf32>
    %139 = vector.shape_cast %138 : vector<1x8x8xf32> to vector<8x8xf32>
    %cst_98 = arith.constant dense<0.000000e+00> : vector<8x128xf32>
    %140 = tpu.matmul %139, %137, %cst_98 {dimension_numbers = #tpu.dot_dimension_numbers<[1], [0], [0], [1], [0, 0, 1, 1], [], []>} : vector<8x8xf32>, vector<8x128xf32>, vector<8x128xf32> -> vector<8x128xf32>
    %141 = arith.addf %103, %140 : vector<8x128xf32>
    %c0_99 = arith.constant 0 : index
    %c0_100 = arith.constant 0 : index
    %142 = vector.load %arg7[%c0_99, %c0_100] : memref<8x128xf32, #tpu.memory_space<vmem>>, vector<8x128xf32>
    tpu.vector_store %arg7[%c0_99, %c0_100], %141 {strides = array<i32>} : memref<8x128xf32, #tpu.memory_space<vmem>>, vector<8x128xf32>,
    return
  }
  func.func @transform_0(%arg0: i32) -> (i32, i32, i32) {
    %c0_i32 = arith.constant 0 : i32
    %c0_i32_0 = arith.constant 0 : i32
    %c0_i32_1 = arith.constant 0 : i32
    return %c0_i32, %c0_i32_0, %arg0 : i32, i32, i32
  }
  func.func @transform_1(%arg0: i32) -> (i32, i32, i32) {
    %c0_i32 = arith.constant 0 : i32
    %c0_i32_0 = arith.constant 0 : i32
    %c0_i32_1 = arith.constant 0 : i32
    %c0_i32_2 = arith.constant 0 : i32
    return %c0_i32, %c0_i32_0, %c0_i32_1 : i32, i32, i32
  }
  func.func @transform_2(%arg0: i32) -> (i32, i32) {
    %c0_i32 = arith.constant 0 : i32
    %c0_i32_0 = arith.constant 0 : i32
    %c0_i32_1 = arith.constant 0 : i32
    return %c0_i32, %c0_i32_0 : i32, i32
  }
  func.func @transform_3(%arg0: i32) -> (i32, i32, i32) {
    %c0_i32 = arith.constant 0 : i32
    %c0_i32_0 = arith.constant 0 : i32
    %c0_i32_1 = arith.constant 0 : i32
    %c0_i32_2 = arith.constant 0 : i32
    return %c0_i32, %c0_i32_0, %c0_i32_1 : i32, i32, i32
  }
  func.func @transform_4(%arg0: i32) -> (i32, i32) {
    %c0_i32 = arith.constant 0 : i32
    %c0_i32_0 = arith.constant 0 : i32
    %c0_i32_1 = arith.constant 0 : i32
    return %c0_i32, %c0_i32_0 : i32, i32
  }
  func.func @transform_5(%arg0: i32) -> (i32, i32) {
    %c0_i32 = arith.constant 0 : i32
    %c0_i32_0 = arith.constant 0 : i32
    %c0_i32_1 = arith.constant 0 : i32
    return %c0_i32, %c0_i32_0 : i32, i32
  }
  func.func @transform_6(%arg0: i32) -> (i32, i32) {
    %c0_i32 = arith.constant 0 : i32
    %c0_i32_0 = arith.constant 0 : i32
    return %c0_i32, %arg0 : i32, i32
  }
}

</mosaic_0001>

<bundles_post_ra>
// kernel: tpu_custom_call.1
= control target key start
LH: loop header
LB: loop body
LE: loop exit
PB: predicated region body
PF: predicated region fallthrough
CT: control target
= control target key end

     0   :  { %vm55_vm0 = vcmask 1043456   ;;  %vm51_vm1 = vcmask 31744   ;;  %s588_s0 = inlined_call_operand.vmem [shape: f32[5,4,128], index: 0, kind: input, shape index: {}]   ;;  %s589_s1 = inlined_call_operand.vmem [shape: f32[3,8,4], index: 1, kind: input, shape index: {}]   ;;  %s590_s2 = inlined_call_operand.vmem [shape: f32[8,1], index: 2, kind: input, shape index: {}]   ;;  %s591_s3 = inlined_call_operand.vmem [shape: f32[3,8,8], index: 3, kind: input, shape index: {}]   ;;  %s592_s4 = inlined_call_operand.vmem [shape: f32[8,1], index: 4, kind: input, shape index: {}]   ;;  %s593_s5 = inlined_call_operand.vmem [shape: f32[8,4], index: 5, kind: input, shape index: {}]   ;;  %s594_s6 = inlined_call_operand.hbm [shape: f32[8,128], index: 6, kind: output, shape index: {}]  }
   0x1   :  { %v80_v0 = vld [vmem:[%s588_s0] sm:$0xf]  ;;  %v430_v2 = vld [vmem:[%s589_s1 + $0x10] sm:$0xff]  ;;  %v421_v3 = vld [vmem:[%s588_s0 + $0x8] sm:$0xf] }
   0x2   :  { %v79_v1 = vld [vmem:[%s589_s1] sm:$0xff]  ;;  %428 = vmatpush.msk.msra.mxu2 %vm55_vm0, %v80_v0  ;;  %v424_v5 = vld [vmem:[%s589_s1 + $0x8] sm:$0xff]  ;;  %431 = vmatpush.msk.msra.mxu3 %vm55_vm0, %v421_v3 }
   0x3   :  { %v425_v4 = vld [vmem:[%s588_s0 + $0x4] sm:$0xf]  ;;  %429 = vmatmul.msk.f32.vlgmr.msra.gmra.mxu2 %vm51_vm1, %v79_v1  ;;  %v439_v6 = vld [vmem:[%s588_s0 + $0xc] sm:$0xf]  ;;  %432 = vmatmul.msk.f32.vlgmr.msra.gmra.mxu3 %vm51_vm1, %v430_v2 }
   0x4   :  { %426 = vmatpush.msk.msra.mxu1 %vm55_vm0, %v425_v4  ;;  %v45_v7 = vld [vmem:[%s593_s5] sm:$0xff] }
   0x5   :  { %11 = vsyncpa [#allocation3], 0  ;;  %427 = vmatmul.msk.f32.vlgmr.msra.gmra.mxu1 %vm51_vm1, %v424_v5  ;;  %437 = vmatpush.msk.msrb.mxu2 %vm55_vm0, %v425_v4  ;;  %v41_v8 = vld [vmem:[%s590_s2] sm:$0xff]  ;;  %v448_v9 = vld [vmem:[%s588_s0 + $0x10] sm:$0xf]  ;;  %v483_v10 = vmov 0   ;;  %v25_v12 = vlaneseq }
   0x6   :  { %422 = vmatpush.msk.msra.mxu0 %vm55_vm0, %v421_v3  ;;  %440 = vmatpush.msk.msrb.mxu3 %vm55_vm0, %v439_v6  ;;  %v42_v11 = vld [vmem:[%s592_s4] sm:$0xff]  ;;  %vm178_vm3 = vcmask 64512   ;;  %v442_v33 = vld [vmem:[%s591_s3 + $0x8] sm:$0xff]  ;;  %v451_v41 = vld [vmem:[%s591_s3 + $0x10] sm:$0xff]  ;;  %s484_s20 = smov [#allocation2]   ;;  %s412_s24 = sshll.u32 %s594_s6, 4  ;;  %s413_s24 = int_to_ptr.hbm [resolvable:$true] %s412_s24 }
   0x7   :  { %423 = vmatmul.msk.f32.vlgmr.msra.gmra.mxu0 %vm51_vm1, %v45_v7  ;;  %456 = vset.pattern.permute.xlu0 %v483_v10  ;;  %v26_v13 = vand.u32 127, %v25_v12  ;;  %v177_v25 = vld [vmem:[%s591_s3] sm:$0xff]  ;;  %s410_s21 = sshll.u32 %s484_s20, 4  ;;  %s411_s21 = int_to_ptr.vmem [resolvable:$true] %s410_s21 }
   0x8   :  { %435 = vmatpush.msk.msrb.mxu1 %vm55_vm0, %v421_v3  ;;  %165 = vperm.xlu0 %456, %v41_v8  }
   0x9   :  { %446 = vmatpush.msk.msra.mxu2 %vm55_vm0, %v421_v3  ;;  %449 = vmatpush.msk.msra.mxu3 %vm55_vm0, %v448_v9  ;;  %v33_v15 = vand.u32 15, %v26_v13 }
   0xa   :  { %444 = vmatpush.msk.msra.mxu1 %vm55_vm0, %v439_v6 }
   0xb   :  { %438 = vmatmul.msk.f32.vlgmr.msrb.gmra.mxu2 %vm51_vm1, %v79_v1  ;;  %441 = vmatmul.msk.f32.vlgmr.msrb.gmra.mxu3 %vm51_vm1, %v430_v2  ;;  %v170_v19 = vadd.s32 4294967295, %v33_v15  ;;  %v371_v37 = vadd.s32 1, %v33_v15 }
   0xd   :  { %436 = vmatmul.msk.f32.vlgmr.msrb.gmra.mxu1 %vm51_vm1, %v424_v5  ;;  %vm171_vm2 = vcmp.ge.s32.totalorder %v170_v19, 0  ;;  %vm373_vm4 = vcmp.lt.s32.totalorder %v371_v37, 16 }
  0x10   :  { %48 = vperm.xlu0 %456, %v42_v11  }
  0x13   :  { %447 = vmatmul.msk.f32.vlgmr.msra.gmra.mxu2 %vm51_vm1, %v79_v1  ;;  %450 = vmatmul.msk.f32.vlgmr.msra.gmra.mxu3 %vm51_vm1, %v430_v2 }
  0x15   :  { %445 = vmatmul.msk.f32.vlgmr.msra.gmra.mxu1 %vm51_vm1, %v424_v5 }
  0x7a   :  { %v166_v21 = vpop.permute.xlu0 %165 }
  0x82   :  { %v108_v14 = vpop.f32.mrf.mxu1  ;;  %v49_v44 = vpop.permute.xlu0 %48 }
  0x84   :  { %v76_v42 = vpop.f32.mrf.mxu0 }
  0x85   :  { %v77_v46 = vadd.f32 %v76_v42, %v49_v44 }
  0x86   :  { %v134_v16 = vpop.f32.mrf.mxu2  ;;  %v159_v18 = vpop.f32.mrf.mxu3 }
  0x87   :  { %v135_v17 = vadd.f32 %v134_v16, %v108_v14 }
  0x89   :  { %v162_v20 = vadd.f32 %v159_v18, %v135_v17 }
  0x8a   :  { %v220_v22 = vpop.f32.mrf.mxu1 }
  0x8b   :  { %v168_v23 = vadd.f32 %v166_v21, %v162_v20 }
  0x8d   :  { %v169_v24 = vmax.f32 %v168_v23, 0.0 }
  0x8e   :  { %v240_v26 = vpop.f32.mrf.mxu2  ;;  %v265_v28 = vpop.f32.mrf.mxu3 }
  0x8f   :  { %v241_v27 = vadd.f32 %v240_v26, %v220_v22  ;;  %433 = vmatpush.msk.msrb.mxu0 %vm171_vm2, %v169_v24 }
  0x90   :  { %434 = vmatmul.msk.f32.vlgmr.msrb.gmra.mxu0 %vm178_vm3, %v177_v25 }
  0x91   :  { %v268_v29 = vadd.f32 %v265_v28, %v241_v27 }
  0x92   :  { %v320_v31 = vpop.f32.mrf.mxu1 }
  0x93   :  { %v269_v30 = vadd.f32 %v268_v29, %v166_v21 }
  0x95   :  { %v270_v32 = vmax.f32 %v269_v30, 0.0 }
  0x96   :  { %v340_v34 = vpop.f32.mrf.mxu2  ;;  %v365_v36 = vpop.f32.mrf.mxu3 }
  0x97   :  { %v341_v35 = vadd.f32 %v340_v34, %v320_v31  ;;  %297 = vmatpush.msra.mxu0 %v270_v32 }
  0x98   :  { %443 = vmatmul.msk.f32.vlgmr.msra.gmra.mxu0 %vm178_vm3, %v442_v33 }
  0x99   :  { %v368_v38 = vadd.f32 %v365_v36, %v341_v35 }
  0x9b   :  { %v369_v39 = vadd.f32 %v368_v38, %v166_v21 }
  0x9d   :  { %v370_v40 = vmax.f32 %v369_v39, 0.0 }
  0x9f   :  { %452 = vmatpush.msk.msrb.mxu0 %vm373_vm4, %v370_v40 }
  0xa0   :  { %453 = vmatmul.msk.f32.vlgmr.msrb.gmra.mxu0 %vm178_vm3, %v451_v41 }
 0x10d   :  { %v199_v43 = vpop.f32.mrf.mxu0 }
 0x10e   :  { %v202_v47 = vadd.f32 %v199_v43, %v77_v46 }
 0x115   :  { %v299_v45 = vpop.f32.mrf.mxu0 }
 0x116   :  { %v302_v48 = vadd.f32 %v299_v45, %v202_v47 }
 0x11d   :  { %v400_v49 = vpop.f32.mrf.mxu0 }
 0x11e   :  { %v403_v50 = vadd.f32 %v400_v49, %v302_v48 }
 0x120   :  { %404 = vst [vmem:[#allocation2] sm:$0xff] %v403_v50 }
 0x121   :  { %415 = dma.vmem_to_hbm [thread:$0]  %s411_s21, 128, %s413_s24, [#allocation3]  }
 0x122   :  { %481 = dma.done.wait [#allocation3], 128  }
 0x123   :  { %482 = vsyncadd [#allocation3], 4294967168 }
 0x124   :  { %420 = vsyncpa [#allocation3], 1 }

</bundles_post_ra>
